<compile_context>
chip_gen: v5e
topology: v5e:2x2
jax: 0.10.0
libtpu: 0.0.40
codegen_flags: <defaults>
</compile_context>

<pallas_src>
import numpy as np

import jax
import jax.numpy as jnp
from jax.experimental import pallas as pl
from jax.experimental.pallas import tpu as pltpu


def _round_up(n: int, m: int) -> int:
    return ((n + m - 1) // m) * m


def _pool_matrix(d_in: int) -> np.ndarray:
    """1-D AvgPool(k=3, stride=2, pad=1, count_include_pad=True) as (d_in, d_out).

    M[k, j] = 1/3 for k in {2j-1, 2j, 2j+1} ∩ [0, d_in); out-of-range taps are
    zero padding but the divisor stays 3 (count_include_pad=True).  Applying
    one such matrix per spatial axis reproduces the 3x3 / 9 average pool.
    """
    d_out = (d_in - 1) // 2 + 1            # floor((d_in + 2*1 - 3)/2) + 1
    m = np.zeros((d_in, d_out), np.float64)
    for j in range(d_out):
        for k in (2 * j - 1, 2 * j, 2 * j + 1):
            if 0 <= k < d_in:
                m[k, j] = 1.0 / 3.0
    return m


def _composed_pool_matrices(H: int, W: int, sampling_times: int):
    """Compose all pyramid levels into A (H, Hf) and B (W, Wf) on the host."""
    a = np.eye(H, dtype=np.float64)
    b = np.eye(W, dtype=np.float64)
    h, w = H, W
    for _ in range(sampling_times):
        mh, mw = _pool_matrix(h), _pool_matrix(w)
        a = a @ mh                          # (H, h_next)
        b = b @ mw                          # (W, w_next)
        h, w = mh.shape[1], mw.shape[1]
    return a, b, h, w                       # A (H, Hf), B (W, Wf)


def _choose_block_images(N: int, C: int, H: int, W: int, itemsize: int) -> int:
    """Images per grid step (Nb).

    Targets: >=256 MXU rows per push (Nb*C*H), amortize the ~0.35 µs per-step
    overhead, keep >=2 grid steps when N>=2 (v7x has two TensorCores), and keep
    the double-buffered input block <=6 MiB per buffer so the block plus its
    f32 intermediates stay comfortably inside v7x's 64 MiB VMEM (and v5e's
    16 MiB default-scoped limit) without a vmem_limit_bytes override.
    """
    per_image = C * H * W * itemsize
    budget = 6 * 1024 * 1024
    divisors = [d for d in range(1, N + 1)
                if N % d == 0 and d * per_image <= budget] or [1]
    cands = [d for d in divisors if N // d >= 2] or divisors
    for d in cands:
        if d * C * H >= 256:
            return d
    return cands[-1]


def _make_kernel(Nb: int, C: int, H: int, W: int, Hfp: int, Wfp: int):
    """Kernel for one block of Nb images: two flat 2-D MXU matmuls + one store."""
    NbC = Nb * C

    def kernel(x_ref, b_ref, a_ref, out_ref):
        # x_ref: (Nb, C, H, W) native dtype; b_ref: (W, Wfp) f32; a_ref: (H, Hfp) f32.
        x = x_ref[...]
        # ---- W pool: one flat MXU matmul covering all Nb*C*H rows -----------
        # (collapse of leading dims; H is sublane-aligned so this is layout-free)
        t = jnp.dot(x.reshape(NbC * H, W), b_ref[...],
                    preferred_element_type=jnp.float32)          # (Nb*C*H, Wfp)
        # ---- bring H into the contracting (minor) position -------------------
        t = t.reshape(NbC, H, Wfp)                                # split (free)
        t = jnp.transpose(t, (0, 2, 1))                           # XLU, small
        t = t.reshape(NbC * Wfp, H)                               # Wfp%8==0 -> free
        # ---- H pool: second flat MXU matmul ----------------------------------
        y = jnp.dot(t, a_ref[...], preferred_element_type=jnp.float32)  # (Nb*C*Wfp, Hfp)
        # ---- reorient to (.., Hf, Wf) and store the whole block once ---------
        y = jnp.transpose(y.reshape(NbC, Wfp, Hfp), (0, 2, 1))    # (Nb*C, Hfp, Wfp)
        out_ref[...] = y.reshape(NbC * Hfp, Wfp).astype(out_ref.dtype)

    return kernel


def avg_downsampler_pallas(x, sampling_times: int):
    N, C, H, W = x.shape
    if sampling_times <= 0:
        return x

    # Host-composed pooling matrices for the whole pyramid (exact: pooling is
    # linear, and the module returns only the final level).
    a_np, b_np, Hf, Wf = _composed_pool_matrices(H, W, sampling_times)

    # Pad pooled extents to sublane multiples (8) so every in-kernel reshape is
    # a layout-free collapse/split; padded columns are zero and sliced off below.
    Hfp, Wfp = _round_up(Hf, 8), _round_up(Wf, 8)
    a_pad = np.zeros((H, Hfp), np.float32)
    a_pad[:, :Hf] = a_np
    b_pad = np.zeros((W, Wfp), np.float32)
    b_pad[:, :Wf] = b_np
    a_dev = jnp.asarray(a_pad)
    b_dev = jnp.asarray(b_pad)

    Nb = _choose_block_images(N, C, H, W, x.dtype.itemsize)
    grid = (N // Nb,)

    kernel = _make_kernel(Nb, C, H, W, Hfp, Wfp)

    out = pl.pallas_call(
        kernel,
        out_shape=jax.ShapeDtypeStruct((N // Nb, Nb * C * Hfp, Wfp), x.dtype),
        grid=grid,
        in_specs=[
            pl.BlockSpec((Nb, C, H, W), lambda s: (s, 0, 0, 0)),   # Nb images/step
            pl.BlockSpec((W, Wfp), lambda s: (0, 0)),              # constant operand
            pl.BlockSpec((H, Hfp), lambda s: (0, 0)),              # constant operand
        ],
        out_specs=pl.BlockSpec((None, Nb * C * Hfp, Wfp), lambda s: (s, 0, 0)),
        compiler_params=pltpu.CompilerParams(
            dimension_semantics=("parallel",)),   # v7x: spread steps over 2 TCs
    )(x, b_dev, a_dev)

    # Undo the layout padding (pure plumbing; output bytes << input bytes).
    return out.reshape(N, C, Hfp, Wfp)[:, :, :Hf, :Wf]


# ------------------------- pure-JAX reference --------------------------------
def avg_downsampler_reference(x, sampling_times: int):
    """nn.AvgPool2d(3, stride=2, padding=1) applied `sampling_times` times."""
    for _ in range(sampling_times):
        s = jax.lax.reduce_window(
            x, jnp.zeros((), x.dtype), jax.lax.add,
            window_dimensions=(1, 1, 3, 3),
            window_strides=(1, 1, 2, 2),
            padding=((0, 0), (0, 0), (1, 1), (1, 1)))
        x = s / 9.0                               # count_include_pad=True
    return x


# ----------------------------------- main -------------------------------------
if __name__ == "__main__":
    N, C, H, W = 2, 4, 16, 16
    sampling_times = 2                            # 16x16 -> 8x8 -> 4x4

    key = jax.random.PRNGKey(0)
    x = jax.random.normal(key, (N, C, H, W), jnp.float32)

    out = jax.block_until_ready(avg_downsampler_pallas(x, sampling_times))
    ref = jax.block_until_ready(avg_downsampler_reference(x, sampling_times))

    assert out.shape == ref.shape == (N, C, 4, 4)
    # Tolerance leaves headroom for DEFAULT-precision (single-pass bf16) MXU
    # rounding; any semantic error (wrong tap/stride/normalization) is >> 1e-1.
    np.testing.assert_allclose(np.asarray(out), np.asarray(ref),
                               rtol=1e-2, atol=1e-2)
    print("KERNEL_OK")
</pallas_src>

<mosaic_0001>
module attributes {stable_mosaic.version = 11 : i64} {
  func.func @kernel(%arg0: i32, %arg1: memref<1x4x16x16xf32, #tpu.memory_space<vmem>>, %arg2: memref<16x8xf32, #tpu.memory_space<vmem>>, %arg3: memref<16x8xf32, #tpu.memory_space<vmem>>, %arg4: memref<1x32x8xf32, #tpu.memory_space<vmem>>) attributes {dimension_semantics = [#tpu.dimension_semantics<parallel>], iteration_bounds = array<i64: 2>, scalar_prefetch = 0 : i64, scratch_operands = 0 : i64, tpu.core_type = #tpu.core_type<tc>, window_params = [{transform_indices = @transform_0, window_bounds = array<i64: 1, 4, 16, 16>}, {pipeline_mode = #tpu.pipeline_mode<synchronous>, transform_indices = @transform_1, window_bounds = array<i64: 16, 8>}, {pipeline_mode = #tpu.pipeline_mode<synchronous>, transform_indices = @transform_2, window_bounds = array<i64: 16, 8>}, {transform_indices = @transform_3, window_bounds = array<i64: 1, 32, 8>}]} {
    %c0 = arith.constant 0 : index
    %c0_0 = arith.constant 0 : index
    %c0_1 = arith.constant 0 : index
    %c0_2 = arith.constant 0 : index
    %0 = vector.load %arg1[%c0, %c0_0, %c0_1, %c0_2] : memref<1x4x16x16xf32, #tpu.memory_space<vmem>>, vector<1x4x16x16xf32>
    %1 = vector.shape_cast %0 : vector<1x4x16x16xf32> to vector<64x16xf32>
    %c0_3 = arith.constant 0 : index
    %c0_4 = arith.constant 0 : index
    %2 = vector.load %arg2[%c0_3, %c0_4] : memref<16x8xf32, #tpu.memory_space<vmem>>, vector<16x8xf32>
    %cst = arith.constant dense<0.000000e+00> : vector<64x8xf32>
    %3 = tpu.matmul %1, %2, %cst {dimension_numbers = #tpu.dot_dimension_numbers<[1], [0], [0], [1], [0, 0, 1, 1], [], []>} : vector<64x16xf32>, vector<16x8xf32>, vector<64x8xf32> -> vector<64x8xf32>
    %4 = vector.shape_cast %3 : vector<64x8xf32> to vector<4x16x8xf32>
    %5 = tpu.transpose %4, [0, 2, 1] : vector<4x16x8xf32> -> vector<4x8x16xf32>
    %6 = vector.shape_cast %5 : vector<4x8x16xf32> to vector<32x16xf32>
    %c0_5 = arith.constant 0 : index
    %c0_6 = arith.constant 0 : index
    %7 = vector.load %arg3[%c0_5, %c0_6] : memref<16x8xf32, #tpu.memory_space<vmem>>, vector<16x8xf32>
    %cst_7 = arith.constant dense<0.000000e+00> : vector<32x8xf32>
    %8 = tpu.matmul %6, %7, %cst_7 {dimension_numbers = #tpu.dot_dimension_numbers<[1], [0], [0], [1], [0, 0, 1, 1], [], []>} : vector<32x16xf32>, vector<16x8xf32>, vector<32x8xf32> -> vector<32x8xf32>
    %9 = vector.shape_cast %8 : vector<32x8xf32> to vector<4x8x8xf32>
    %10 = tpu.transpose %9, [0, 2, 1] : vector<4x8x8xf32> -> vector<4x8x8xf32>
    %11 = vector.shape_cast %10 : vector<4x8x8xf32> to vector<32x8xf32>
    %c0_8 = arith.constant 0 : index
    %c0_9 = arith.constant 0 : index
    %c0_10 = arith.constant 0 : index
    %12 = vector.load %arg4[%c0_8, %c0_9, %c0_10] : memref<1x32x8xf32, #tpu.memory_space<vmem>>, vector<1x32x8xf32>
    %13 = vector.shape_cast %12 : vector<1x32x8xf32> to vector<32x8xf32>
    %14 = vector.shape_cast %11 : vector<32x8xf32> to vector<1x32x8xf32>
    tpu.vector_store %arg4[%c0_8, %c0_9, %c0_10], %14 {strides = array<i32>} : memref<1x32x8xf32, #tpu.memory_space<vmem>>, vector<1x32x8xf32>,
    return
  }
  func.func @transform_0(%arg0: i32) -> (i32, i32, i32, i32) {
    %c0_i32 = arith.constant 0 : i32
    %c0_i32_0 = arith.constant 0 : i32
    %c0_i32_1 = arith.constant 0 : i32
    %c0_i32_2 = arith.constant 0 : i32
    return %arg0, %c0_i32, %c0_i32_0, %c0_i32_1 : i32, i32, i32, i32
  }
  func.func @transform_1(%arg0: i32) -> (i32, i32) {
    %c0_i32 = arith.constant 0 : i32
    %c0_i32_0 = arith.constant 0 : i32
    %c0_i32_1 = arith.constant 0 : i32
    return %c0_i32, %c0_i32_0 : i32, i32
  }
  func.func @transform_2(%arg0: i32) -> (i32, i32) {
    %c0_i32 = arith.constant 0 : i32
    %c0_i32_0 = arith.constant 0 : i32
    %c0_i32_1 = arith.constant 0 : i32
    return %c0_i32, %c0_i32_0 : i32, i32
  }
  func.func @transform_3(%arg0: i32) -> (i32, i32, i32) {
    %c0_i32 = arith.constant 0 : i32
    %c0_i32_0 = arith.constant 0 : i32
    %c0_i32_1 = arith.constant 0 : i32
    return %arg0, %c0_i32, %c0_i32_0 : i32, i32, i32
  }
}

</mosaic_0001>

<bundles_post_ra>
// kernel: tpu_custom_call.1
= control target key start
LH: loop header
LB: loop body
LE: loop exit
PB: predicated region body
PF: predicated region fallthrough
CT: control target
= control target key end

     0   :  { %8 = vsyncpa [#allocation3], 0  ;;  %s918_s0 = inlined_call_operand.hbm [shape: f32[2,4,16,16], index: 0, kind: input, shape index: {}]   ;;  %s919_s1 = inlined_call_operand.vmem [shape: f32[16,8], index: 1, kind: input, shape index: {}]   ;;  %s920_s2 = inlined_call_operand.vmem [shape: f32[16,8], index: 2, kind: input, shape index: {}]   ;;  %s921_s3 = inlined_call_operand.vmem [shape: f32[2,32,8], index: 3, kind: output, shape index: {}]  }
   0x1   :  { %10 = vsyncpa [#allocation3 + $0x1], 0  ;;  %s802_s12 = smov 0   ;;  %s804_s13 = smov 0  }
   0x2   :  { %s806_s14 = smov 0   ;;  %s808_s15 = smov 0  }
   0x3 LB: > { %s821_s16 = sadd.s32 4294967295, %s778_s15   ;;  %s824_s17 = sadd.s32 1, %s778_s15   ;;  %s778_s15 = sphi %s808_s15, %s928_s15   ;;  %s774_s14 = sphi %s806_s14, %s927_s14   ;;  %s770_s13 = sphi %s804_s13, %s926_s13   ;;  %s766_s12 = sphi %s802_s12, %s925_s12  }
   0x4   : > { %s20_s18 = ssub.s32 %s778_s15, %s824_s17  ;;  %s23_s19 = sadd.s32 1, %s774_s14 }
   0x5   : > { %p21_p0 = scmp.eq.s32.totalorder %s20_s18, 0  ;;  %p30_p1 = scmp.ne.s32.totalorder %s774_s14, %s770_s13 }
   0x6   : > { %p31_p2 = scmp.eq.s32.totalorder %s778_s15, 0  ;;  %p36_p3 = scmp.ne.s32.totalorder %s770_s13, %s766_s12 }
   0x7   : > { %s834_s20 = scalar_select %p21_p0, %s774_s14, %s23_s19  }
   0x8   : > { %p836_p4 = por %p31_p2, %p30_p1  ;;  %p37_p5 = scmp.eq.s32.totalorder %s821_s16, 0 }
   0x9   : > { %p678_p6 = scmp.lt.s32.totalorder %s778_s15, 2  ;;  %s134_s23 = sand.u32 1, %s774_s14  }
   0xa   : > { %p842_p7 = por %p37_p5, %p36_p3  ;;  %s643_s24 = sshll.u32 %s134_s23, 6 }
   0xb   : > { %s664_s25 = sshll.u32 %s778_s15, 6  ;;  %s138_s29 = scalar_lea.vmem [#allocation2], %s643_s24 }
   0xc   : > { %s143_s28 = scalar_lea.hbm %s918_s0, %s664_s25  ;;  %s146_s30 = sshll.u32 %s138_s29, 4  ;;  %s147_s30 = int_to_ptr.vmem [resolvable:$true] %s146_s30 }
   0xd   : > { %s144_s4 = sshll.u32 %s143_s28, 4  ;;  %p853_p8 = pnand %p678_p6, %p836_p4  ;;  %s145_s4 = int_to_ptr.hbm [resolvable:$true] %s144_s4 }
   0xe   : > { %p646_p9 = scmp.ge.s32.totalorder %s778_s15, 1  ;;  %s135_s6 = scalar_lea.sflag [#allocation3], %s134_s23 }
   0xf   : > { %s714_s7 = sshra.s32 %s145_s4, 4  ;;  %p718_p11 = pneg %p853_p8  ;;  %s715_s7 = int_to_ptr.hbm [resolvable:$true] %s714_s7 }
  0x10   : > { %s716_s8 = scalar_lea.hbm %s715_s7, 64  ;;  %s721_s11 = scalar_lea.hbm %s918_s0, 128 }
  0x11   : > { %p717_p10 = scmp.ne.s32.totalorder %s715_s7, %s716_s8  ;;  %p722_p0 = scmp.lt.s32.totalorder %s715_s7, %s918_s0 }
  0x12   : > { %p723_p1 = scmp.lt.s32.totalorder %s721_s11, %s716_s8 }
  0x13   : > { %p719_p12 = pnand %p718_p11, %p717_p10 }
  0x14   : > { %p724_p2 = por %p723_p1, %p722_p0 }
  0x15   : > { %p720_p13 = pneg %p719_p12 }
  0x17   : > { %p725_p3 = pnand %p724_p2, %p720_p13 }
  0x19   : > { %728 = shalt.err (!%p725_p3)
}
  0x1a   : > { %s780_s19 = smov 128   ;;  %s781_s21 = smov 8  }
  0x1b   : > { %677 = dma.hbm_to_vmem [thread:$0]  (!%p853_p8), %s145_s4, 1024, %s147_s30, %s135_s6, %s780_s19, %s780_s19, %s781_s21  }
  0x1c   : > { %p154_p4 = scmp.lt.s32.totalorder %s778_s15, 3 }
  0x1e   : > { %p155_p5 = pnand %p646_p9, %p154_p4 }
  0x1f   : > { %s160_s23 = sand.u32 (!%p155_p5), 1, %s770_s13  }
  0x20   : > { %158 = sbr.rel (%p155_p5) target bundleno = 649 (0x289), region = 32  ;;  %s647_s24 = sshll.u32 (!%p155_p5), %s160_s23, 6 }
  0x21   : > { %s161_s25 = scalar_lea.sflag (!%p155_p5), [#allocation3], %s160_s23  ;;  %s164_s26 = scalar_lea.vmem (!%p155_p5), [#allocation2], %s647_s24 }
  0x25   : > { %761 = dma.done.wait (%p842_p7), %s161_s25, 1024  }
  0x26   : > { %763 = vsyncadd (%p842_p7), %s161_s25, 4294966272  ;;  %v202_v0 = vld [vmem:[%s919_s1 + $0x8] sm:$0xff]  ;;  %v201_v1 = vld [vmem:[%s919_s1] sm:$0xff]  ;;  %vm203_vm0 = vcmask 130048   ;;  %p188_p6 = scmp.lt.s32.totalorder %s821_s16, 1  ;;  %vm568_vm1 = vcmask 64512  }
  0x27   : > { %242 = vmatpush.msra.mxu0 %v202_v0  ;;  %v193_v2 = vld [vmem:[%s164_s26] sm:$0xff]  ;;  %666 = vmatpush.msra.mxu2 %v202_v0  ;;  %v196_v3 = vld [vmem:[%s164_s26 + $0x18] sm:$0xff]  ;;  %v199_v4 = vld [vmem:[%s164_s26 + $0x30] sm:$0xff] }
  0x28   : > { %667 = vmatpush.msra.mxu3 %v202_v0  ;;  %v194_v5 = vld [vmem:[%s164_s26 + $0x8] sm:$0xff]  ;;  %v197_v6 = vld [vmem:[%s164_s26 + $0x20] sm:$0xff]  ;;  %v200_v7 = vld [vmem:[%s164_s26 + $0x38] sm:$0xff]  ;;  %s930_s16 = smov (!%p188_p6, %s821_s16), 1 }
  0x29   : > { %243 = vmatpush.msra.mxu0 %v201_v1  ;;  %668 = vmatpush.msra.mxu2 %v201_v1  ;;  %v195_v8 = vld [vmem:[%s164_s26 + $0x10] sm:$0xff]  ;;  %v198_v9 = vld [vmem:[%s164_s26 + $0x28] sm:$0xff]  ;;  %v397_v11 = vld [vmem:[%s920_s2] sm:$0xff]  ;;  %s665_s6 = sshll.u32 %s930_s16, 5 }
  0x2a   : > { %650 = vmatmul.msk.f32.vlgmr.msra.gmra.mxu0 %vm203_vm0, %v193_v2  ;;  %653 = vmatmul.msk.f32.vlgmr.msra.gmra.mxu2 %vm203_vm0, %v196_v3  ;;  %v398_v10 = vld [vmem:[%s920_s2 + $0x8] sm:$0xff]  ;;  %s192_s9 = scalar_lea.vmem %s921_s3, %s665_s6 }
  0x2b   : > { %669 = vmatpush.msra.mxu3 %v201_v1  ;;  %425 = vmatpush.msra.mxu1 %v398_v10 }
  0x2c   : > { %656 = vmatmul.msk.f32.vlgmr.msra.gmra.mxu3 %vm203_vm0, %v199_v4 }
  0x2d   : > { %670 = vmatpush.msrb.mxu3 %v398_v10  ;;  %426 = vmatpush.msra.mxu1 %v397_v11 }
  0x2f   : > { %671 = vmatpush.msrb.mxu3 %v397_v11 }
  0x32   : > { %651 = vmatmul.msk.f32.gmra.mxu0 %vm203_vm0, %v194_v5  ;;  %654 = vmatmul.msk.f32.gmra.mxu2 %vm203_vm0, %v197_v6 }
  0x34   : > { %657 = vmatmul.msk.f32.gmra.mxu3 %vm203_vm0, %v200_v7 }
  0x3a   : > { %652 = vmatmul.msk.f32.gmra.mxu0 %vm203_vm0, %v195_v8  ;;  %655 = vmatmul.msk.f32.gmra.mxu2 %vm203_vm0, %v198_v9 }
  0xa7   : > { %v245_v12 = vpop.f32.mrf.mxu0 }
  0xa8   : > { %269 = vxpose.xlu0.b32.start [1/2] (short) (narrow) %v245_v12, 8 }
  0xad   : > { %v254_v13 = vpop.f32.mrf.mxu2 }
  0xaf   : > { %v248_v14 = vpop.f32.mrf.mxu0  ;;  %v263_v15 = vpop.f32.mrf.mxu3 }
  0xb0   : > { %270 = vxpose.xlu0.b32.end [2/2] (short) (narrow) %v248_v14, 8  ;;  %365 = vxpose.xlu2.b32.start [1/2] (short) (narrow) %v263_v15, 8 }
  0xb5   : > { %v257_v16 = vpop.f32.mrf.mxu2 }
  0xb7   : > { %v251_v17 = vpop.f32.mrf.mxu0  ;;  %v266_v18 = vpop.f32.mrf.mxu3 }
  0xb8   : > { %301 = vxpose.xlu1.b32.start [1/2] (short) (narrow) %v251_v17, 8  ;;  %333 = vxpose.xlu0.b32.start [1/2] (short) (narrow) %v257_v16, 8 }
  0xb9   : > { %366 = vxpose.xlu2.b32.end [2/2] (short) (narrow) %v266_v18, 8 }
  0xbd   : > { %v260_v19 = vpop.f32.mrf.mxu2 }
  0xc0   : > { %302 = vxpose.xlu1.b32.end [2/2] (short) (narrow) %v254_v13, 8  ;;  %334 = vxpose.xlu0.b32.end [2/2] (short) (narrow) %v260_v19, 8 }
 0x14a   : > { %v381_v20 = vpop.trf.xlu2 }
 0x14b   : > { %661 = vmatmul.msk.f32.vlgmr.msrb.gmra.mxu3 %vm203_vm0, %v381_v20 }
 0x14c   : > { %v285_v21 = vpop.trf.xlu0 }
 0x14d   : > { %658 = vmatmul.msk.f32.vlgmr.msra.gmra.mxu1 %vm203_vm0, %v285_v21 }
 0x15c   : > { %v317_v22 = vpop.trf.xlu1  ;;  %v349_v23 = vpop.trf.xlu0 }
 0x15d   : > { %659 = vmatmul.msk.f32.gmra.mxu1 %vm203_vm0, %v317_v22 }
 0x165   : > { %660 = vmatmul.msk.f32.gmra.mxu1 %vm203_vm0, %v349_v23 }
 0x1ca   : > { %v428_v24 = vpop.f32.mrf.mxu1 }
 0x1cb   : > { %440 = vxpose.xlu1.b32.start.end [1/1] (short) (narrow) %v428_v24, 8 }
 0x1ce   : > { %v437_v26 = vpop.f32.mrf.mxu3 }
 0x1da   : > { %v431_v25 = vpop.f32.mrf.mxu1 }
 0x1db   : > { %472 = vxpose.xlu2.b32.start.end [1/1] (short) (narrow) %v431_v25, 8 }
 0x1e2   : > { %v434_v27 = vpop.f32.mrf.mxu1 }
 0x1e3   : > { %504 = vxpose.xlu1.b32.start.end [1/1] (short) (narrow) %v434_v27, 8  ;;  %536 = vxpose.xlu2.b32.start.end [1/1] (short) (narrow) %v437_v26, 8 }
 0x26f   : > { %v456_v28 = vpop.trf.xlu1 }
 0x270   : > { %569 = vst.msk [vmem:[%s192_s9] sm:$0xff] %vm568_vm1, %v456_v28 }
 0x274   : > { %v488_v29 = vpop.trf.xlu2 }
 0x275   : > { %570 = vst.msk [vmem:[%s192_s9 + $0x8] sm:$0xff] %vm568_vm1, %v488_v29 }
 0x27c   : > { %v552_v30 = vpop.trf.xlu2 }
 0x27d   : > { %572 = vst.msk [vmem:[%s192_s9 + $0x18] sm:$0xff] %vm568_vm1, %v552_v30 }
 0x287   : > { %v520_v31 = vpop.trf.xlu1 }
 0x288   : > { %571 = vst.msk [vmem:[%s192_s9 + $0x10] sm:$0xff] %vm568_vm1, %v520_v31 }
 0x289 PF: > { %p13_p7 = scmp.ge.s32.totalorder %s824_s17, 4   ;;  %s925_s12 = smov %s770_s13 }
 0x28a   : > { %s926_s13 = smov %s774_s14  ;;  %s927_s14 = smov %s834_s20 }
 0x28b   : > { %s928_s15 = smov %s824_s17  ;;  %15 = sbr.rel (!%p13_p7) target bundleno = 3 (0x3), region = 72 }
 0x290   :  { %594 = vsyncpa [#allocation3], 1 }
 0x291   :  { %596 = vsyncpa [#allocation3 + $0x1], 1 }

</bundles_post_ra>
